<compile_context>
chip_gen: v7x
topology: tpu7x:2x2x1
jax: 0.10.0
libtpu: 0.0.40
codegen_flags: <defaults>
</compile_context>

<pallas_src>
import functools

import jax
import jax.numpy as jnp
from jax.experimental import pallas as pl
from jax.experimental.pallas import tpu as pltpu


def _make_intervention_kernel(exact: bool):
    """Build the kernel body. `exact=True` keeps the literal 3-matmul form."""

    def kernel(temp_ref, masks_ref, base_ref, source_ref, rot_ref, out_ref):
        rot = rot_ref[...]                  # (D, D), MXU dtype, grid-resident
        mxu_dt = rot.dtype

        # boundary mask: sigmoid(masks / temperature) -> (1, D) f32.
        # Scalar reciprocal instead of a vector divide.
        inv_temp = 1.0 / temp_ref[0, 0]
        m = jax.nn.sigmoid(masks_ref[...] * inv_temp)        # (1, D) f32

        base = base_ref[...]                # (TB, D), activation dtype
        source = source_ref[...]            # (TB, D)

        if exact:
            # Literal module math; fuse both forward rotations into ONE MXU
            # call by stacking base and source along the M dimension.
            tb = base.shape[0]
            stacked = jnp.concatenate([base, source], axis=0).astype(mxu_dt)
            rotated = jnp.dot(stacked, rot,
                              preferred_element_type=jnp.float32)  # (2TB, D) f32
            rb = rotated[:tb]
            rs = rotated[tb:]
            ro = (1.0 - m) * rb + m * rs                      # f32 blend
            # ro @ R.T without materializing rot.T (contract dim 1 with dim 1).
            # Only the MXU operand is downcast; accumulation stays f32.
            out = jax.lax.dot_general(
                ro.astype(mxu_dt), rot,
                dimension_numbers=(((1,), (1,)), ((), ())),
                preferred_element_type=jnp.float32)
        else:
            # Orthogonality shortcut: out = base + (m * ((source-base) @ R)) @ R.T
            diff = source.astype(jnp.float32) - base.astype(jnp.float32)
            rot_diff = jnp.dot(diff.astype(mxu_dt), rot,
                               preferred_element_type=jnp.float32)   # (TB, D) f32
            masked = rot_diff * m                                     # f32
            delta = jax.lax.dot_general(
                masked.astype(mxu_dt), rot,
                dimension_numbers=(((1,), (1,)), ((), ())),           # masked @ R.T
                preferred_element_type=jnp.float32)
            out = base.astype(jnp.float32) + delta

        out_ref[...] = out.astype(out_ref.dtype)

    return kernel


def _round_up(x: int, m: int) -> int:
    return (x + m - 1) // m * m


@functools.partial(jax.jit, static_argnames=("block_b", "exact", "mxu_dtype"))
def sigmoid_mask_rotated_space_intervention(base, source, rot, masks, temperature,
                                            *, block_b=None, exact: bool = False,
                                            mxu_dtype=jnp.bfloat16):
    """base/source: (B, D); rot: (D, D) orthogonal; masks: (D,); temperature: scalar."""
    B, D = base.shape
    assert source.shape == (B, D) and rot.shape == (D, D) and masks.shape == (D,)

    # Cast the rotation once in the wrapper so the kernel's MXU operands are
    # native bf16 (or stay f32 when mxu_dtype=float32).
    rot_mxu = rot if rot.dtype == jnp.dtype(mxu_dtype) else rot.astype(mxu_dtype)
    masks_2d = jnp.asarray(masks, jnp.float32).reshape(1, D)
    temp_2d = jnp.asarray(temperature, jnp.float32).reshape(1, 1)

    in_isz = jnp.dtype(base.dtype).itemsize
    rot_isz = jnp.dtype(rot_mxu.dtype).itemsize
    rot_bytes = D * D * rot_isz              # single-buffered (pl.Buffered(1))
    masks_bytes = _round_up(D * 4, 4096)

    # Clamp the scoped-VMEM limit to what the chip actually has (v7x: 64 MiB).
    try:
        vmem_cap = int(getattr(pltpu.get_tpu_info(), "vmem_capacity_bytes", 64 << 20))
    except Exception:  # pragma: no cover - conservative fallback
        vmem_cap = 64 << 20

    # Per batch-row VMEM: double-buffered base/source/out tiles + f32 temps.
    per_row = D * (2 * 2 * in_isz + 2 * in_isz + 6 * 4)
    usable = vmem_cap - rot_bytes - masks_bytes - (8 << 20)   # compiler headroom
    tb_budget = max(8, (max(usable, 0) // per_row) // 8 * 8)

    TB = min(block_b if block_b is not None else 1024, tb_budget, _round_up(B, 8))
    TB = max(8, TB // 8 * 8)
    # Keep >= 2 tiles for larger batches so v7x's two TensorCores both get
    # work on the "parallel" batch axis (no-op for single-core v5e/v6e).
    if B >= 64:
        TB = min(TB, max(8, _round_up(pl.cdiv(B, 2), 8)))
    n_tiles = pl.cdiv(B, TB)

    vmem_limit = int(min(max(rot_bytes + masks_bytes + TB * per_row + (8 << 20),
                             32 << 20), vmem_cap))

    n_matmuls = 3 if exact else 2
    cost = pl.CostEstimate(
        flops=2 * n_matmuls * n_tiles * TB * D * D,
        transcendentals=n_tiles * D,
        bytes_accessed=3 * B * D * in_isz + D * D * rot_isz + D * 4,
    )

    return pl.pallas_call(
        _make_intervention_kernel(exact),
        out_shape=jax.ShapeDtypeStruct((B, D), base.dtype),
        grid_spec=pltpu.PrefetchScalarGridSpec(
            num_scalar_prefetch=0,
            grid=(n_tiles,),
            in_specs=[
                pl.BlockSpec((1, 1), lambda i: (0, 0),
                             memory_space=pltpu.SMEM),                  # temperature
                pl.BlockSpec((1, D), lambda i: (0, 0),
                             pipeline_mode=pl.Buffered(1)),             # masks (resident)
                pl.BlockSpec((TB, D), lambda i: (i, 0)),                # base tile
                pl.BlockSpec((TB, D), lambda i: (i, 0)),                # source tile
                pl.BlockSpec((D, D), lambda i: (0, 0),
                             pipeline_mode=pl.Buffered(1)),             # rot (resident)
            ],
            out_specs=pl.BlockSpec((TB, D), lambda i: (i, 0)),          # lane-dense out
        ),
        compiler_params=pltpu.CompilerParams(
            dimension_semantics=("parallel",),
            vmem_limit_bytes=vmem_limit,
        ),
        cost_estimate=cost,
    )(temp_2d, masks_2d, base, source, rot_mxu)


if __name__ == "__main__":
    key = jax.random.PRNGKey(0)
    k_base, k_src, k_rot, k_b2, k_s2, k_b3, k_s3 = jax.random.split(key, 7)

    D = 128  # embed_dim

    # Deterministic orthogonal rotation (like torch's orthogonal parametrization).
    rot, _ = jnp.linalg.qr(jax.random.normal(k_rot, (D, D), dtype=jnp.float32))

    # Module __init__: masks = 100.0 per dim, temperature = 50.0.
    masks = jnp.full((D,), 100.0, dtype=jnp.float32)
    temperature = jnp.float32(50.0)

    def reference(base, source):
        hi = jax.lax.Precision.HIGHEST
        b32 = base.astype(jnp.float32)
        s32 = source.astype(jnp.float32)
        rb = jnp.dot(b32, rot, precision=hi)
        rs = jnp.dot(s32, rot, precision=hi)
        m = jax.nn.sigmoid(masks / temperature)[None, :]
        ro = (1.0 - m) * rb + m * rs
        return jnp.dot(ro, rot.T, precision=hi)

    # Case 1: default path (orthogonality shortcut, bf16 MXU operands, f32 acc).
    B1 = 8
    base1 = jax.random.normal(k_base, (B1, D), dtype=jnp.float32)
    source1 = jax.random.normal(k_src, (B1, D), dtype=jnp.float32)
    out1 = jax.block_until_ready(
        sigmoid_mask_rotated_space_intervention(base1, source1, rot, masks, temperature))
    assert out1.shape == (B1, D) and out1.dtype == base1.dtype
    assert jnp.allclose(out1, reference(base1, source1), atol=5e-2, rtol=5e-2)

    # Case 2: ragged batch (exercises the pad-free last tile) with the exact
    # 3-matmul form and full-precision f32 MXU operands.
    B2 = 12
    base2 = jax.random.normal(k_b2, (B2, D), dtype=jnp.float32)
    source2 = jax.random.normal(k_s2, (B2, D), dtype=jnp.float32)
    out2 = jax.block_until_ready(
        sigmoid_mask_rotated_space_intervention(base2, source2, rot, masks, temperature,
                                                exact=True, mxu_dtype=jnp.float32))
    assert out2.shape == (B2, D) and out2.dtype == base2.dtype
    assert jnp.allclose(out2, reference(base2, source2), atol=1e-3, rtol=1e-3)

    # Case 3: bf16 activations end-to-end (halves per-tile HBM traffic).
    B3 = 16
    base3 = jax.random.normal(k_b3, (B3, D), dtype=jnp.bfloat16)
    source3 = jax.random.normal(k_s3, (B3, D), dtype=jnp.bfloat16)
    out3 = jax.block_until_ready(
        sigmoid_mask_rotated_space_intervention(base3, source3, rot, masks, temperature))
    assert out3.shape == (B3, D) and out3.dtype == jnp.bfloat16
    assert jnp.allclose(out3.astype(jnp.float32), reference(base3, source3),
                        atol=1e-1, rtol=1e-1)

    print("KERNEL_OK")
</pallas_src>

<mosaic_0001>
module attributes {stable_mosaic.version = 11 : i64} {
  func.func @kernel(%arg0: i32, %arg1: memref<1x1xf32, #tpu.memory_space<smem>>, %arg2: memref<1x128xf32, #tpu.memory_space<vmem>>, %arg3: memref<8x128xf32, #tpu.memory_space<vmem>>, %arg4: memref<8x128xf32, #tpu.memory_space<vmem>>, %arg5: memref<128x128xbf16, #tpu.memory_space<vmem>>, %arg6: memref<8x128xf32, #tpu.memory_space<vmem>>) attributes {dimension_semantics = [#tpu.dimension_semantics<parallel>], iteration_bounds = array<i64: 1>, scalar_prefetch = 0 : i64, scratch_operands = 0 : i64, tpu.core_type = #tpu.core_type<tc>, window_params = [{transform_indices = @transform_0, window_bounds = array<i64: 1, 1>}, {pipeline_mode = #tpu.pipeline_mode<synchronous>, transform_indices = @transform_1, window_bounds = array<i64: 1, 128>}, {transform_indices = @transform_2, window_bounds = array<i64: 8, 128>}, {transform_indices = @transform_3, window_bounds = array<i64: 8, 128>}, {pipeline_mode = #tpu.pipeline_mode<synchronous>, transform_indices = @transform_4, window_bounds = array<i64: 128, 128>}, {transform_indices = @transform_5, window_bounds = array<i64: 8, 128>}]} {
    %c0 = arith.constant 0 : index
    %c0_0 = arith.constant 0 : index
    %0 = vector.load %arg5[%c0, %c0_0] : memref<128x128xbf16, #tpu.memory_space<vmem>>, vector<128x128xbf16>
    %c0_1 = arith.constant 0 : index
    %c0_2 = arith.constant 0 : index
    %1 = memref.load %arg1[%c0_1, %c0_2] : memref<1x1xf32, #tpu.memory_space<smem>>
    %cst = arith.constant 1.000000e+00 : f32
    %2 = arith.divf %cst, %1 : f32
    %c0_3 = arith.constant 0 : index
    %c0_4 = arith.constant 0 : index
    %3 = vector.load %arg2[%c0_3, %c0_4] : memref<1x128xf32, #tpu.memory_space<vmem>>, vector<1x128xf32>
    %4 = vector.broadcast %2 : f32 to vector<1x128xf32>
    %5 = arith.mulf %3, %4 : vector<1x128xf32>
    %6 = arith.negf %5 : vector<1x128xf32>
    %7 = math.exp %6 : vector<1x128xf32>
    %cst_5 = arith.constant 1.000000e+00 : f32
    %8 = vector.broadcast %cst_5 : f32 to vector<1x128xf32>
    %9 = arith.addf %8, %7 : vector<1x128xf32>
    %10 = arith.divf %8, %9 : vector<1x128xf32>
    %c0_6 = arith.constant 0 : index
    %c0_7 = arith.constant 0 : index
    %11 = vector.load %arg3[%c0_6, %c0_7] : memref<8x128xf32, #tpu.memory_space<vmem>>, vector<8x128xf32>
    %c0_8 = arith.constant 0 : index
    %c0_9 = arith.constant 0 : index
    %12 = vector.load %arg4[%c0_8, %c0_9] : memref<8x128xf32, #tpu.memory_space<vmem>>, vector<8x128xf32>
    %13 = arith.subf %12, %11 : vector<8x128xf32>
    %14 = arith.truncf %13 : vector<8x128xf32> to vector<8x128xbf16>
    %cst_10 = arith.constant dense<0.000000e+00> : vector<8x128xf32>
    %15 = tpu.matmul %14, %0, %cst_10 {dimension_numbers = #tpu.dot_dimension_numbers<[1], [0], [0], [1], [0, 0, 1, 1], [], []>} : vector<8x128xbf16>, vector<128x128xbf16>, vector<8x128xf32> -> vector<8x128xf32>
    %16 = vector.broadcast %10 : vector<1x128xf32> to vector<8x128xf32>
    %17 = arith.mulf %15, %16 : vector<8x128xf32>
    %18 = arith.truncf %17 : vector<8x128xf32> to vector<8x128xbf16>
    %cst_11 = arith.constant dense<0.000000e+00> : vector<8x128xf32>
    %19 = tpu.matmul %18, %0, %cst_11 {dimension_numbers = #tpu.dot_dimension_numbers<[1], [1], [0], [0], [0, 0, 1, 0], [], []>} : vector<8x128xbf16>, vector<128x128xbf16>, vector<8x128xf32> -> vector<8x128xf32>
    %20 = arith.addf %11, %19 : vector<8x128xf32>
    %c0_12 = arith.constant 0 : index
    %c0_13 = arith.constant 0 : index
    %21 = vector.load %arg6[%c0_12, %c0_13] : memref<8x128xf32, #tpu.memory_space<vmem>>, vector<8x128xf32>
    tpu.vector_store %arg6[%c0_12, %c0_13], %20 {strides = array<i32>} : memref<8x128xf32, #tpu.memory_space<vmem>>, vector<8x128xf32>,
    return
  }
  func.func @transform_0(%arg0: i32) -> (i32, i32) {
    %c0_i32 = arith.constant 0 : i32
    %c0_i32_0 = arith.constant 0 : i32
    %c0_i32_1 = arith.constant 0 : i32
    return %c0_i32, %c0_i32_0 : i32, i32
  }
  func.func @transform_1(%arg0: i32) -> (i32, i32) {
    %c0_i32 = arith.constant 0 : i32
    %c0_i32_0 = arith.constant 0 : i32
    %c0_i32_1 = arith.constant 0 : i32
    return %c0_i32, %c0_i32_0 : i32, i32
  }
  func.func @transform_2(%arg0: i32) -> (i32, i32) {
    %c0_i32 = arith.constant 0 : i32
    %c0_i32_0 = arith.constant 0 : i32
    return %arg0, %c0_i32 : i32, i32
  }
  func.func @transform_3(%arg0: i32) -> (i32, i32) {
    %c0_i32 = arith.constant 0 : i32
    %c0_i32_0 = arith.constant 0 : i32
    return %arg0, %c0_i32 : i32, i32
  }
  func.func @transform_4(%arg0: i32) -> (i32, i32) {
    %c0_i32 = arith.constant 0 : i32
    %c0_i32_0 = arith.constant 0 : i32
    %c0_i32_1 = arith.constant 0 : i32
    return %c0_i32, %c0_i32_0 : i32, i32
  }
  func.func @transform_5(%arg0: i32) -> (i32, i32) {
    %c0_i32 = arith.constant 0 : i32
    %c0_i32_0 = arith.constant 0 : i32
    return %arg0, %c0_i32 : i32, i32
  }
}

</mosaic_0001>

<bundles_post_ra>
// kernel: sigmoid_mask_rotated_space_intervention.1
= control target key start
LH: loop header
LB: loop body
LE: loop exit
PB: predicated region body
PF: predicated region fallthrough
CT: control target
= control target key end

     0   :  { %v318_v2 = vmov 0.0   ;;  %vm319_vm0 = vmmov 0   ;;  %s399_s0 = inlined_call_operand.<no memory space> [shape: f32[1,1], index: 0, kind: input, shape index: {}]   ;;  %s400_s1 = inlined_call_operand.vmem [shape: f32[1,128], index: 1, kind: input, shape index: {}]   ;;  %s401_s2 = inlined_call_operand.vmem [shape: f32[8,128], index: 2, kind: input, shape index: {}]   ;;  %s402_s3 = inlined_call_operand.vmem [shape: f32[8,128], index: 3, kind: input, shape index: {}]   ;;  %s403_s4 = inlined_call_operand.vmem [shape: bf16[128,128], index: 4, kind: input, shape index: {}]   ;;  %s404_s5 = inlined_call_operand.hbm [shape: f32[8,128], index: 5, kind: output, shape index: {}]  }
   0x1   :  { %v280_v0 = vld [vmem:[%s403_s4] sm:$0xff]   ;;  %v40_v1 = vstv %s399_s0  ;;  %235 = vmatprep.subr.bf16.mxu0 %v318_v2  ;;  %255 = vmatprep.subr.bf16.mxu1 %v318_v2  ;;  %v281_v3 = vld [vmem:[%s403_s4 + $0x8] sm:$0xff]   ;;  %v282_v4 = vld [vmem:[%s403_s4 + $0x10] sm:$0xff]  }
   0x2   :  { %288 = vrcp.f32 %v40_v1  ;;  %236 = vmatpush3.bf16.msra.mxu0 %v280_v0  ;;  %251 = vmatprep.mubr.msk.bf16.mxu0 %vm319_vm0, %v318_v2 }
   0x3   :  { %237 = vmatprep.subr.bf16.mxu0 %v318_v2  ;;  %256 = vmatpush3.bf16.xpose.msra.mxu1 %v280_v0 }
   0x4   :  { %257 = vmatprep.subr.bf16.mxu1 %v318_v2  ;;  %271 = vmatprep.mubr.msk.bf16.mxu1 %vm319_vm0, %v318_v2 }
   0x6   :  { %238 = vmatpush3.bf16.msra.mxu0 %v281_v3 }
   0x7   :  { %239 = vmatprep.subr.bf16.mxu0 %v318_v2 }
   0x8   :  { %11 = vsyncpa [#allocation4], 0  ;;  %v283_v5 = vld [vmem:[%s403_s4 + $0x18] sm:$0xff]   ;;  %v284_v7 = vld [vmem:[%s403_s4 + $0x20] sm:$0xff]   ;;  %v145_v21 = vlaneseq }
   0x9   :  { %v285_v8 = vld [vmem:[%s403_s4 + $0x28] sm:$0xff]   ;;  %v286_v9 = vld [vmem:[%s403_s4 + $0x30] sm:$0xff]   ;;  %v52_v10 = vld [vmem:[%s401_s2] sm:$0xff] }
   0xa   :  { %240 = vmatpush3.bf16.msra.mxu0 %v282_v4  ;;  %v53_v11 = vld [vmem:[%s402_s3] sm:$0xff]  ;;  %v287_v13 = vld [vmem:[%s403_s4 + $0x38] sm:$0xff]   ;;  %v146_v22 = vshrl.u32 %v145_v21, 7 }
   0xb   :  { %241 = vmatprep.subr.bf16.mxu0 %v318_v2  ;;  %258 = vmatpush3.bf16.xpose.msra.mxu1 %v281_v3  ;;  %v54_v12 = vsub.f32 %v53_v11, %v52_v10  ;;  %v43_v15 = vld [vmem:[%s400_s1] sm:$0x1]  ;;  %s320_s1 = smov [#allocation3]  }
   0xc   :  { %v289_v6 = vpop.eup %288  ;;  %259 = vmatprep.subr.bf16.mxu1 %v318_v2  ;;  %v147_v23 = vsub.s32 0, %v146_v22  ;;  %s200_s4 = sshll.u32 %s320_s1, 4  ;;  %s201_s4 = int_to_ptr.vmem [resolvable:$true] %s200_s4 }
   0xd   :  { %275 = vpush %v289_v6  ;;  %v55_v14 = vpack.c.bf16 %v54_v12, %v54_v12  ;;  %s294_s15 = scalar_lea.vmem %s201_s4, 128  ;;  %p299_p1 = scmp.lt.s32.totalorder %s201_s4, %s201_s4 }
   0xe   :  { %242 = vmatpush3.bf16.msra.mxu0 %v283_v5  ;;  %p295_p0 = scmp.ne.s32.totalorder %s201_s4, %s294_s15  ;;  %p300_p2 = scmp.lt.s32.totalorder %s294_s15, %s294_s15 }
   0xf   :  { %243 = vmatprep.subr.bf16.mxu0 %v318_v2 }
  0x10   :  { %p301_p3 = por %p300_p2, %p299_p1 }
  0x12   :  { %244 = vmatpush3.bf16.msra.mxu0 %v284_v7  ;;  %p302_p4 = pnand %p301_p3, %p295_p0 }
  0x13   :  { %245 = vmatprep.subr.bf16.mxu0 %v318_v2  ;;  %260 = vmatpush3.bf16.xpose.msra.mxu1 %v282_v4 }
  0x14   :  { %261 = vmatprep.subr.bf16.mxu1 %v318_v2 }
  0x16   :  { %246 = vmatpush3.bf16.msra.mxu0 %v285_v8 }
  0x17   :  { %247 = vmatprep.subr.bf16.mxu0 %v318_v2 }
  0x1a   :  { %248 = vmatpush3.bf16.msra.mxu0 %v286_v9 }
  0x1b   :  { %249 = vmatprep.subr.bf16.mxu0 %v318_v2  ;;  %262 = vmatpush3.bf16.xpose.msra.mxu1 %v283_v5 }
  0x1c   :  { %263 = vmatprep.subr.bf16.mxu1 %v318_v2 }
  0x1e   :  { %250 = vmatpush3.bf16.msra.mxu0 %v287_v13 }
  0x21   :  { %252 = vmatmul.mubr.bf16.vlgmr.msra.gmra.mrb[0].mxu0 %v55_v14 }
  0x23   :  { %264 = vmatpush3.bf16.xpose.msra.mxu1 %v284_v7 }
  0x24   :  { %265 = vmatprep.subr.bf16.mxu1 %v318_v2 }
  0x2b   :  { %266 = vmatpush3.bf16.xpose.msra.mxu1 %v285_v8 }
  0x2c   :  { %267 = vmatprep.subr.bf16.mxu1 %v318_v2 }
  0x33   :  { %268 = vmatpush3.bf16.xpose.msra.mxu1 %v286_v9 }
  0x34   :  { %269 = vmatprep.subr.bf16.mxu1 %v318_v2 }
  0x3b   :  { %270 = vmatpush3.bf16.xpose.msra.mxu1 %v287_v13 }
  0x3e   :  { %s276_s2 = spop %275 }
  0x3f   :  { %v44_v16 = vstv %s276_s2 }
  0x40   :  { %v45_v17 = vmul.f32 %v44_v16, %v43_v15 }
  0x42   :  { %v208_v18 = vmul.f32 -1.442695, %v45_v17 }
  0x44   :  { %290 = vpow2.f32 %v208_v18 }
  0x4e   :  { %v291_v19 = vpop.eup %290 }
  0x4f   :  { %v49_v20 = vadd.f32 1.0, %v291_v19 }
  0x51   :  { %292 = vrcp.f32 %v49_v20 }
  0x5b   :  { %v293_v24 = vpop.eup %292 }
  0x5c   :  { %v148_v25 = vrot.slane %v293_v24, %v147_v23 }
  0xf4   :  { %v138_v26 = vpop.f32.mrb[0].mxu0 }
  0xf5   :  { %v150_v27 = vmul.f32 %v148_v25, %v138_v26  ;;  %v253_v28 = vpop.f32.mrb[1].mxu0 }
  0xf6   :  { %v141_v29 = vpop.f32.mrb[2].mxu0 }
  0xf7   :  { %v151_v30 = vpack.c.bf16 %v150_v27, %v150_v27  ;;  %v254_v31 = vpop.f32.mrb[3].mxu0 }
  0xf9   :  { %272 = vmatmul.mubr.bf16.vlgmr.msra.gmra.mrb[0].mxu1 %v151_v30 }
 0x1cc   :  { %v186_v32 = vpop.f32.mrb[0].mxu1 }
 0x1cd   :  { %v192_v33 = vadd.f32 %v186_v32, %v52_v10  ;;  %v273_v34 = vpop.f32.mrb[1].mxu1 }
 0x1ce   :  { %v189_v35 = vpop.f32.mrb[2].mxu1 }
 0x1cf   :  { %193 = vst [vmem:[#allocation3] sm:$0xff] %v192_v33  ;;  %v274_v36 = vpop.f32.mrb[3].mxu1 }
 0x1d0   :  { %305 = shalt.err (!%p302_p4)
}
 0x1d1   :  { %s306_s18 = scalar_lea.hbm %s404_s5, 128 }
 0x1d2   :  { %p307_p5 = scmp.ne.s32.totalorder %s404_s5, %s306_s18  ;;  %p310_p6 = scmp.lt.u32.totalorder %s306_s18, %s404_s5 }
 0x1d4   :  { %p312_p7 = pnand %p310_p6, %p307_p5 }
 0x1d6   :  { %315 = shalt.err (!%p312_p7)
}
 0x1d7   :  { %203 = dma.vmem_to_hbm [thread:$0]  %s201_s4, 128, %s404_s5, [#allocation4]  }
 0x1d8   :  { %316 = dma.done.wait [#allocation4], 128  }
 0x1d9   :  { %317 = vsyncadd [#allocation4], 4294967168 }
 0x1da   :  { %207 = vsyncpa [#allocation4], 1 }

</bundles_post_ra>
